<compile_context>
chip_gen: v7x
topology: tpu7x:2x2x1
jax: 0.10.0
libtpu: 0.0.40
codegen_flags: <defaults>
</compile_context>

<pallas_src>
import jax
import jax.numpy as jnp
from jax.experimental import pallas as pl
from jax.experimental.pallas import tpu as pltpu


def _make_charbonnier_kernel(scale_init: float, scale_lb: float):
    def kernel(x_ref, s_ref, o_ref):
        # Upcast to f32 for the transcendental path (v5e has no bf16 VPU/EUP).
        x = x_ref[...].astype(jnp.float32)
        z = s_ref[...].astype(jnp.float32) + scale_init
        # Numerically stable softplus: log(1+exp(z)) = max(z,0) + log(1+exp(-|z|)).
        sp = jnp.maximum(z, 0.0) + jnp.log(1.0 + jnp.exp(-jnp.abs(z)))
        s = sp + scale_lb
        t = x / s
        o_ref[...] = (jnp.sqrt(t * t + 1.0) - 1.0).astype(o_ref.dtype)

    return kernel


_LANE_WIDTHS = (1024, 512, 256, 128)   # preferred lane-dense last dims (multiples of 128)
_TILE_BYTES = 4 * 1024 * 1024          # per-array, per-buffer VMEM budget (f32)


def _lane_dense_2d(n, fallback):
    """Pick a (rows, cols) factorization with cols a wide multiple of 128."""
    for cols in _LANE_WIDTHS:
        if n % cols == 0:
            return n // cols, cols
    return fallback  # last resort: (bs*c, h*w); full-extent last dim is still legal


def charbonnier_nll(x, scale, *, scale_init: float = 0.5413, scale_lb: float = 1e-5):
    """x: [bs_recs, 1, h, w]; scale: any shape with bs_recs*1*h*w elements."""
    bs, c, h, w = x.shape
    assert c == 1, "CharbonnierNLL expects a single channel"

    n = bs * c * h * w
    rows, cols = _lane_dense_2d(n, fallback=(bs * c, h * w))

    # Flatten both operands to the same lane-dense slab (free layout reshape).
    # The scale dtype cast happens inside the kernel, not as a wrapper-side convert.
    x2 = jnp.reshape(x, (rows, cols))
    s2 = jnp.reshape(scale, (rows, cols))

    # Largest row tile whose 3 streams x 2 double-buffers fit the VMEM budget.
    # Second-to-last block dim must be a multiple of 8 unless it spans the array.
    if rows <= 8:
        tile_rows = rows
    else:
        tile_rows = max(8, min(rows, _TILE_BYTES // (cols * 4)) // 8 * 8)
        tile_rows = min(tile_rows, rows)

    grid = (pl.cdiv(rows, tile_rows),)
    block = (tile_rows, cols)
    kernel = _make_charbonnier_kernel(float(scale_init), float(scale_lb))

    out2 = pl.pallas_call(
        kernel,
        out_shape=jax.ShapeDtypeStruct((rows, cols), x.dtype),
        grid=grid,
        in_specs=[
            pl.BlockSpec(block, lambda i: (i, 0)),
            pl.BlockSpec(block, lambda i: (i, 0)),
        ],
        out_specs=pl.BlockSpec(block, lambda i: (i, 0)),
        compiler_params=pltpu.CompilerParams(
            # Rows are independent -> megacore sharding on v7x; neutral on v5e/v6e.
            dimension_semantics=("parallel",),
            # 3 streams x 2 buffers x 4 MiB = 24 MiB + headroom; safe on 64 MiB v7x.
            vmem_limit_bytes=48 << 20,
        ),
    )(x2, s2)

    return jnp.reshape(out2, (bs, c, h, w))


def charbonnier_nll_ref(x, scale, *, scale_init: float = 0.5413, scale_lb: float = 1e-5):
    bs, c, h, w = x.shape
    s = jnp.reshape(scale, (bs, c, h, w)).astype(jnp.float32)
    s = jax.nn.softplus(s + scale_init) + scale_lb
    t = x.astype(jnp.float32) / s
    return (jnp.sqrt(t * t + 1.0) - 1.0).astype(x.dtype)


if __name__ == "__main__":
    key = jax.random.PRNGKey(0)
    kx, ks = jax.random.split(key)

    bs_recs, c, h, w = 2, 1, 16, 16   # CharbonnierNLL asserts c == 1
    x = jax.random.normal(kx, (bs_recs, c, h, w), dtype=jnp.float32)
    scale = jax.random.normal(ks, (bs_recs, c, h, w), dtype=jnp.float32)

    out = charbonnier_nll(x, scale)
    out = jax.block_until_ready(out)

    ref = charbonnier_nll_ref(x, scale)
    assert out.shape == (bs_recs, c, h, w)
    assert jnp.allclose(out, ref, rtol=1e-4, atol=1e-5)

    print("KERNEL_OK")
</pallas_src>

<mosaic_0001>
module attributes {stable_mosaic.version = 11 : i64} {
  func.func @kernel(%arg0: i32, %arg1: memref<1x512xf32, #tpu.memory_space<vmem>>, %arg2: memref<1x512xf32, #tpu.memory_space<vmem>>, %arg3: memref<1x512xf32, #tpu.memory_space<vmem>>) attributes {dimension_semantics = [#tpu.dimension_semantics<parallel>], iteration_bounds = array<i64: 1>, scalar_prefetch = 0 : i64, scratch_operands = 0 : i64, tpu.core_type = #tpu.core_type<tc>, window_params = [{transform_indices = @transform_0, window_bounds = array<i64: 1, 512>}, {transform_indices = @transform_1, window_bounds = array<i64: 1, 512>}, {transform_indices = @transform_2, window_bounds = array<i64: 1, 512>}]} {
    %c0 = arith.constant 0 : index
    %c0_0 = arith.constant 0 : index
    %0 = vector.load %arg1[%c0, %c0_0] : memref<1x512xf32, #tpu.memory_space<vmem>>, vector<1x512xf32>
    %c0_1 = arith.constant 0 : index
    %c0_2 = arith.constant 0 : index
    %1 = vector.load %arg2[%c0_1, %c0_2] : memref<1x512xf32, #tpu.memory_space<vmem>>, vector<1x512xf32>
    %cst = arith.constant 5.413000e-01 : f32
    %2 = vector.broadcast %cst : f32 to vector<1x512xf32>
    %3 = arith.addf %1, %2 : vector<1x512xf32>
    %cst_3 = arith.constant 0.000000e+00 : f32
    %4 = vector.broadcast %cst_3 : f32 to vector<1x512xf32>
    %5 = arith.maximumf %3, %4 : vector<1x512xf32>
    %6 = math.absf %3 : vector<1x512xf32>
    %cst_4 = arith.constant 0.000000e+00 : f32
    %7 = vector.broadcast %cst_4 : f32 to vector<1x512xf32>
    %8 = arith.subf %7, %6 : vector<1x512xf32>
    %9 = math.exp %8 : vector<1x512xf32>
    %cst_5 = arith.constant 1.000000e+00 : f32
    %10 = vector.broadcast %cst_5 : f32 to vector<1x512xf32>
    %11 = arith.addf %10, %9 : vector<1x512xf32>
    %12 = math.log %11 : vector<1x512xf32>
    %13 = arith.addf %5, %12 : vector<1x512xf32>
    %cst_6 = arith.constant 9.99999974E-6 : f32
    %14 = vector.broadcast %cst_6 : f32 to vector<1x512xf32>
    %15 = arith.addf %13, %14 : vector<1x512xf32>
    %16 = arith.divf %0, %15 : vector<1x512xf32>
    %17 = arith.mulf %16, %16 : vector<1x512xf32>
    %cst_7 = arith.constant 1.000000e+00 : f32
    %18 = vector.broadcast %cst_7 : f32 to vector<1x512xf32>
    %19 = arith.addf %17, %18 : vector<1x512xf32>
    %20 = math.sqrt %19 : vector<1x512xf32>
    %cst_8 = arith.constant 1.000000e+00 : f32
    %21 = vector.broadcast %cst_8 : f32 to vector<1x512xf32>
    %22 = arith.subf %20, %21 : vector<1x512xf32>
    %c0_9 = arith.constant 0 : index
    %c0_10 = arith.constant 0 : index
    %23 = vector.load %arg3[%c0_9, %c0_10] : memref<1x512xf32, #tpu.memory_space<vmem>>, vector<1x512xf32>
    tpu.vector_store %arg3[%c0_9, %c0_10], %22 {strides = array<i32>} : memref<1x512xf32, #tpu.memory_space<vmem>>, vector<1x512xf32>,
    return
  }
  func.func @transform_0(%arg0: i32) -> (i32, i32) {
    %c0_i32 = arith.constant 0 : i32
    %c0_i32_0 = arith.constant 0 : i32
    return %arg0, %c0_i32 : i32, i32
  }
  func.func @transform_1(%arg0: i32) -> (i32, i32) {
    %c0_i32 = arith.constant 0 : i32
    %c0_i32_0 = arith.constant 0 : i32
    return %arg0, %c0_i32 : i32, i32
  }
  func.func @transform_2(%arg0: i32) -> (i32, i32) {
    %c0_i32 = arith.constant 0 : i32
    %c0_i32_0 = arith.constant 0 : i32
    return %arg0, %c0_i32 : i32, i32
  }
}

</mosaic_0001>

<bundles_post_ra>
// kernel: tpu_custom_call.1
= control target key start
LH: loop header
LB: loop body
LE: loop exit
PB: predicated region body
PF: predicated region fallthrough
CT: control target
= control target key end

     0   :  { %7 = vsyncpa [#allocation3], 0  ;;  %s220_s0 = inlined_call_operand.hbm [shape: f32[1,512], index: 0, kind: input, shape index: {}]   ;;  %s221_s1 = inlined_call_operand.hbm [shape: f32[1,512], index: 1, kind: input, shape index: {}]   ;;  %s222_s2 = inlined_call_operand.hbm [shape: f32[1,512], index: 2, kind: output, shape index: {}]  }
   0x1   :  { %8 = vsyncpa [#allocation6], 0 }
   0x2   :  { %9 = vsyncpa [#allocation4], 0  ;;  %s166_s9 = smov [#allocation2]   ;;  %s167_s11 = smov [#allocation5]  }
   0x3   :  { %s16_s10 = sshll.u32 %s166_s9, 4  ;;  %s26_s12 = sshll.u32 %s167_s11, 4  ;;  %s17_s10 = int_to_ptr.vmem [resolvable:$true] %s16_s10  ;;  %s27_s12 = int_to_ptr.vmem [resolvable:$true] %s26_s12 }
   0x4   :  { %s94_s15 = scalar_lea.hbm %s220_s0, 64 }
   0x5   :  { %p95_p0 = scmp.ne.s32.totalorder %s220_s0, %s94_s15  ;;  %p98_p1 = scmp.lt.u32.totalorder %s94_s15, %s220_s0 }
   0x7   :  { %p100_p2 = pnand %p98_p1, %p95_p0 }
   0x9   :  { %103 = shalt.err (!%p100_p2)
}
   0xa   :  { %s104_s20 = scalar_lea.vmem %s17_s10, 64  ;;  %p109_p4 = scmp.lt.s32.totalorder %s17_s10, %s17_s10 }
   0xb   :  { %p105_p3 = scmp.ne.s32.totalorder %s17_s10, %s104_s20  ;;  %p110_p5 = scmp.lt.s32.totalorder %s104_s20, %s104_s20 }
   0xd   :  { %p111_p6 = por %p110_p5, %p109_p4 }
   0xf   :  { %p112_p7 = pnand %p111_p6, %p105_p3 }
  0x11   :  { %115 = shalt.err (!%p112_p7)
}
  0x12   :  { %19 = dma.hbm_to_vmem [thread:$0]  %s220_s0, 64, %s17_s10, [#allocation3]  }
  0x13   :  { %s116_s25 = scalar_lea.hbm %s221_s1, 64 }
  0x14   :  { %p117_p8 = scmp.ne.s32.totalorder %s221_s1, %s116_s25  ;;  %p120_p9 = scmp.lt.u32.totalorder %s116_s25, %s221_s1 }
  0x16   :  { %p122_p10 = pnand %p120_p9, %p117_p8 }
  0x18   :  { %125 = shalt.err (!%p122_p10)
}
  0x19   :  { %s126_s30 = scalar_lea.vmem %s27_s12, 64  ;;  %p131_p12 = scmp.lt.s32.totalorder %s27_s12, %s27_s12 }
  0x1a   :  { %p127_p11 = scmp.ne.s32.totalorder %s27_s12, %s126_s30  ;;  %p132_p13 = scmp.lt.s32.totalorder %s126_s30, %s126_s30 }
  0x1c   :  { %p133_p0 = por %p132_p13, %p131_p12 }
  0x1e   :  { %p134_p1 = pnand %p133_p0, %p127_p11 }
  0x20   :  { %137 = shalt.err (!%p134_p1)
}
  0x21   :  { %29 = dma.hbm_to_vmem [thread:$0]  %s221_s1, 64, %s27_s12, [#allocation6]  }
  0x22   :  { %160 = dma.done.wait [#allocation3], 64  }
  0x23   :  { %161 = vsyncadd [#allocation3], 4294967232 }
  0x24   :  { %162 = dma.done.wait [#allocation6], 64  }
  0x25   :  { %163 = vsyncadd [#allocation6], 4294967232  ;;  %v37_v0 = vld [vmem:[#allocation5] sm:$0xf]  ;;  %v36_v12 = vld [vmem:[#allocation2] sm:$0xf]  ;;  %v61_v19 = vlaneseq }
  0x26   :  { %v38_v1 = vadd.f32 0.5413, %v37_v0  ;;  %s168_s1 = smov [#allocation7]  }
  0x27   :  { %s72_s4 = sshll.u32 %s168_s1, 4  ;;  %vm63_vm2 = vcmp.lt.s32.totalorder %v61_v19, 512  ;;  %s73_s4 = int_to_ptr.vmem [resolvable:$true] %s72_s4 }
  0x28   :  { %v40_v2 = vand.u32 2147483647, %v38_v1  ;;  %v39_v7 = vmax.f32 %v38_v1, 0.0  ;;  %s138_s5 = scalar_lea.vmem %s73_s4, 64  ;;  %p143_p3 = scmp.lt.s32.totalorder %s73_s4, %s73_s4 }
  0x29   :  { %p139_p2 = scmp.ne.s32.totalorder %s73_s4, %s138_s5  ;;  %p144_p4 = scmp.lt.s32.totalorder %s138_s5, %s138_s5 }
  0x2a   :  { %v41_v3 = vsub.f32 0.0, %v40_v2 }
  0x2b   :  { %p145_p5 = por %p144_p4, %p143_p3 }
  0x2c   :  { %v42_v4 = vmul.f32 1.442695, %v41_v3 }
  0x2d   :  { %p146_p6 = pnand %p145_p5, %p139_p2 }
  0x2e   :  { %86 = vpow2.f32 %v42_v4 }
  0x38   :  { %v87_v5 = vpop.eup %86 }
  0x39   :  { %v44_v6 = vadd.f32 1.0, %v87_v5 }
  0x3b   :  { %88 = vlog2.f32 %v44_v6 }
  0x45   :  { %v89_v8 = vpop.eup %88 }
  0x46   :  { %v46_v9 = vmul.f32 0.6931472, %v89_v8 }
  0x48   :  { %v47_v10 = vadd.f32 %v46_v9, %v39_v7 }
  0x4a   :  { %v48_v11 = vadd.f32 1e-05, %v47_v10 }
  0x4c   :  { %90 = vrcp.f32 %v48_v11 }
  0x56   :  { %v91_v13 = vpop.eup %90 }
  0x57   :  { %v50_v14 = vmul.f32 %v91_v13, %v36_v12 }
  0x59   :  { %v51_v15 = vmul.f32 %v50_v14, %v50_v14 }
  0x5b   :  { %v52_v16 = vadd.f32 1.0, %v51_v15 }
  0x5d   :  { %92 = vrsqrt.f32 %v52_v16  ;;  %vm55_vm0 = vcmp.eq.f32.partialorder %v52_v16, inf  ;;  %v58_v18 = vand.u32 2147483648, %v52_v16  ;;  %vm57_vm1 = vcmp.eq.f32.partialorder %v52_v16, 0.0 }
  0x67   :  { %v93_v17 = vpop.eup %92 }
  0x68   :  { %v54_v20 = vmul.f32 %v93_v17, %v52_v16 }
  0x6a   :  { %v56_v21 = vsel %vm55_vm0, %v52_v16, %v54_v20 }
  0x6b   :  { %v59_v22 = vsel %vm57_vm1, %v58_v18, %v56_v21 }
  0x6c   :  { %v82_v23 = vadd.f32 -1.0, %v59_v22 }
  0x6e   :  { %65 = vst.msk [vmem:[#allocation7] sm:$0xf] %vm63_vm2, %v82_v23 }
  0x6f   :  { %149 = shalt.err (!%p146_p6)
}
  0x70   :  { %s150_s8 = scalar_lea.hbm %s222_s2, 64 }
  0x71   :  { %p151_p7 = scmp.ne.s32.totalorder %s222_s2, %s150_s8  ;;  %p154_p8 = scmp.lt.u32.totalorder %s150_s8, %s222_s2 }
  0x73   :  { %p156_p9 = pnand %p154_p8, %p151_p7 }
  0x75   :  { %159 = shalt.err (!%p156_p9)
}
  0x76   :  { %75 = dma.vmem_to_hbm [thread:$0]  %s73_s4, 64, %s222_s2, [#allocation4]  }
  0x77   :  { %164 = dma.done.wait [#allocation4], 64  }
  0x78   :  { %165 = vsyncadd [#allocation4], 4294967232 }
  0x79   :  { %79 = vsyncpa [#allocation3], 1 }
  0x7a   :  { %80 = vsyncpa [#allocation6], 1 }
  0x7b   :  { %81 = vsyncpa [#allocation4], 1 }

</bundles_post_ra>
